<compile_context>
chip_gen: v7x
topology: tpu7x:2x2x1
jax: 0.10.0
libtpu: 0.0.40
codegen_flags: <defaults>
</compile_context>

<pallas_src>
import jax
import jax.numpy as jnp
from jax.experimental import pallas as pl
from jax.experimental.pallas import tpu as pltpu


def _round_up(x, m):
    return ((x + m - 1) // m) * m


# ---------------------------------------------------------------------------
# Pure-XLA reference (also the recommended path for tiny inputs).
# ---------------------------------------------------------------------------
def conv_transpose_1x1_p1_relu_reference(x, w):
    # x: (N, 1, H, W); w: (1, 1, 1, 1) in PyTorch ConvTranspose2d layout.
    return jnp.maximum(x[:, :, 1:-1, 1:-1] * w[0, 0, 0, 0], 0.0)


# ---------------------------------------------------------------------------
# Path 1: batch-fused full-spatial blocks (small / medium images).
# ---------------------------------------------------------------------------
def _batched_kernel(w_ref, x_ref, o_ref):
    # w_ref: SMEM (1, 1) scalar weight
    # x_ref: VMEM (Nb, H, W)   Nb full images per grid step
    # o_ref: VMEM (Nb, Hc, Wc) cropped outputs for the same Nb images
    _, Hc, Wc = o_ref.shape
    w = w_ref[0, 0]                                # scalar read from SMEM
    x_int = x_ref[:, 1:1 + Hc, 1:1 + Wc]           # fused border crop (static slice)
    o_ref[...] = jnp.maximum(x_int * w, 0.0)       # VPU scale + ReLU, no MXU


def _batched_path(x3, w_smem, Hc, Wc, block_budget_bytes):
    N, H, W = x3.shape
    itemsize = x3.dtype.itemsize
    # VMEM footprint of one image, accounting for (8, 128) lane/sublane padding.
    img_vmem = _round_up(H, 8) * _round_up(W, 128) * itemsize
    Nb = int(max(1, min(N, block_budget_bytes // max(img_vmem, 1))))

    return pl.pallas_call(
        _batched_kernel,
        out_shape=jax.ShapeDtypeStruct((N, Hc, Wc), x3.dtype),
        grid=(pl.cdiv(N, Nb),),
        in_specs=[
            pl.BlockSpec(memory_space=pltpu.MemorySpace.SMEM),   # weight scalar
            pl.BlockSpec((Nb, H, W), lambda b: (b, 0, 0)),       # Nb fused images
        ],
        out_specs=pl.BlockSpec((Nb, Hc, Wc), lambda b: (b, 0, 0)),
        compiler_params=pltpu.CompilerParams(
            dimension_semantics=("parallel",),       # megacore sharding on v7x
            vmem_limit_bytes=32 * 1024 * 1024,       # explicit, fits v5e..v7x
        ),
    )(w_smem, x3)


# ---------------------------------------------------------------------------
# Path 2: row-tiled fallback for large spatial sizes.  The crop is done by the
# DMA itself (element-offset copy), so the kernel computes on an aligned tile
# and only the interior (N*Hc*Wc) is ever read from HBM.
# ---------------------------------------------------------------------------
def _rowtile_kernel(w_ref, x_hbm, o_hbm, xbuf, sem):
    # w_ref: SMEM (1, 1); x_hbm: (N, H, W) HBM; o_hbm: (N, Hc, Wc) HBM
    # xbuf:  VMEM (Hr, Wc) scratch; sem: DMA semaphores (2,)
    Hr, Wc = xbuf.shape
    Hc = o_hbm.shape[1]
    n = pl.program_id(0)
    r = pl.program_id(1)

    # Clamp the window so the last (ragged) tile stays in bounds.  Overlapping
    # rows between consecutive tiles are rewritten with identical values.
    row_out0 = jnp.minimum(r * Hr, Hc - Hr)

    # Crop-in-DMA: fetch exactly the interior rows/cols of this tile.
    cp_in = pltpu.make_async_copy(
        x_hbm.at[n, pl.ds(row_out0 + 1, Hr), pl.ds(1, Wc)], xbuf, sem.at[0])
    cp_in.start()
    cp_in.wait()

    xbuf[...] = jnp.maximum(xbuf[...] * w_ref[0, 0], 0.0)

    cp_out = pltpu.make_async_copy(
        xbuf, o_hbm.at[n, pl.ds(row_out0, Hr)], sem.at[1])
    cp_out.start()
    cp_out.wait()


def _rowtile_path(x3, w_smem, Hc, Wc, block_budget_bytes):
    N, H, W = x3.shape
    itemsize = x3.dtype.itemsize
    Wp = _round_up(Wc, 128)
    rows = max(8, (block_budget_bytes // (Wp * itemsize)) // 8 * 8)
    Hr = int(min(Hc, rows))

    return pl.pallas_call(
        _rowtile_kernel,
        out_shape=jax.ShapeDtypeStruct((N, Hc, Wc), x3.dtype),
        grid=(N, pl.cdiv(Hc, Hr)),
        in_specs=[
            pl.BlockSpec(memory_space=pltpu.MemorySpace.SMEM),   # weight scalar
            pl.BlockSpec(memory_space=pl.ANY),                   # raw HBM input
        ],
        out_specs=pl.BlockSpec(memory_space=pl.ANY),             # raw HBM output
        scratch_shapes=[
            pltpu.VMEM((Hr, Wc), x3.dtype),
            pltpu.SemaphoreType.DMA((2,)),
        ],
        compiler_params=pltpu.CompilerParams(
            dimension_semantics=("arbitrary", "arbitrary"),
            vmem_limit_bytes=32 * 1024 * 1024,
        ),
    )(w_smem, x3)


# ---------------------------------------------------------------------------
# Public wrapper (ConvTranspose2d(1,1,k=1,s=1,p=1,bias=False) + ReLU forward).
# ---------------------------------------------------------------------------
def conv_transpose_1x1_p1_relu(x, w, *, block_budget_bytes=2 * 1024 * 1024):
    """x: (N, 1, H, W) float32; w: (1, 1, 1, 1) float32 (PyTorch layout)."""
    N, Cin, H, W = x.shape
    Cin_w, Cout = w.shape[0], w.shape[1]
    assert Cin == 1 and Cin_w == 1 and Cout == 1, \
        "kernel specialized to in_channels=out_channels=1"
    pad = 1
    Hc, Wc = H - 2 * pad, W - 2 * pad
    assert Hc > 0 and Wc > 0, "spatial dims too small for padding=1 transposed conv"

    x3 = x.reshape(N, H, W)          # free squeeze of the size-1 channel dim
    w_smem = w.reshape(1, 1)         # single scalar weight -> SMEM

    itemsize = x3.dtype.itemsize
    img_vmem = _round_up(H, 8) * _round_up(W, 128) * itemsize
    if img_vmem <= block_budget_bytes:
        out3 = _batched_path(x3, w_smem, Hc, Wc, block_budget_bytes)
    else:
        out3 = _rowtile_path(x3, w_smem, Hc, Wc, block_budget_bytes)

    return out3.reshape(N, 1, Hc, Wc)   # free un-squeeze back to NCHW


if __name__ == "__main__":
    key = jax.random.PRNGKey(0)
    kx, kw, kx2 = jax.random.split(key, 3)

    # Module config: in_channels=1, out_channels=1, kernel_size=1, stride=1, padding=1
    N, C, H, W = 2, 1, 16, 16
    x = jax.random.normal(kx, (N, C, H, W), dtype=jnp.float32)
    # ConvTranspose2d weight shape: (in_channels, out_channels, kH, kW).
    w = jax.random.uniform(kw, (1, 1, 1, 1), dtype=jnp.float32,
                           minval=-1.0, maxval=1.0)

    # Path 1: batch-fused full-spatial blocks (single grid step for this shape).
    y = conv_transpose_1x1_p1_relu(x, w)
    jax.block_until_ready(y)
    ref = conv_transpose_1x1_p1_relu_reference(x, w)
    assert y.shape == (N, 1, H - 2, W - 2)
    assert jnp.allclose(y, ref, atol=1e-5, rtol=1e-5)

    # Path 2: row-tiled fallback with crop-in-DMA, exercised by shrinking the
    # per-block VMEM budget so one image no longer "fits" (3 row tiles, ragged
    # last tile handled by window clamping).
    x_big = jax.random.normal(kx2, (1, 1, 40, 24), dtype=jnp.float32)
    y2 = conv_transpose_1x1_p1_relu(x_big, w, block_budget_bytes=16 * 128 * 4)
    jax.block_until_ready(y2)
    ref2 = conv_transpose_1x1_p1_relu_reference(x_big, w)
    assert y2.shape == (1, 1, 38, 22)
    assert jnp.allclose(y2, ref2, atol=1e-5, rtol=1e-5)

    print("KERNEL_OK")
</pallas_src>

<mosaic_0001>
module attributes {stable_mosaic.version = 11 : i64} {
  func.func @_batched_kernel(%arg0: i32, %arg1: memref<1x1xf32, #tpu.memory_space<smem>>, %arg2: memref<2x16x16xf32, #tpu.memory_space<vmem>>, %arg3: memref<2x14x14xf32, #tpu.memory_space<vmem>>) attributes {dimension_semantics = [#tpu.dimension_semantics<parallel>], iteration_bounds = array<i64: 1>, scalar_prefetch = 0 : i64, scratch_operands = 0 : i64, tpu.core_type = #tpu.core_type<tc>, window_params = [{transform_indices = @transform_0, window_bounds = array<i64: 1, 1>}, {transform_indices = @transform_1, window_bounds = array<i64: 2, 16, 16>}, {transform_indices = @transform_2, window_bounds = array<i64: 2, 14, 14>}]} {
    %c0 = arith.constant 0 : index
    %c0_0 = arith.constant 0 : index
    %0 = memref.load %arg1[%c0, %c0_0] : memref<1x1xf32, #tpu.memory_space<smem>>
    %c0_1 = arith.constant 0 : index
    %c1 = arith.constant 1 : index
    %c1_2 = arith.constant 1 : index
    %1 = vector.load %arg2[%c0_1, %c1, %c1_2] : memref<2x16x16xf32, #tpu.memory_space<vmem>>, vector<2x14x14xf32>
    %2 = vector.broadcast %0 : f32 to vector<2x14x14xf32>
    %3 = arith.mulf %1, %2 : vector<2x14x14xf32>
    %cst = arith.constant 0.000000e+00 : f32
    %4 = vector.broadcast %cst : f32 to vector<2x14x14xf32>
    %5 = arith.maximumf %3, %4 : vector<2x14x14xf32>
    %c0_3 = arith.constant 0 : index
    %c0_4 = arith.constant 0 : index
    %c0_5 = arith.constant 0 : index
    %6 = vector.load %arg3[%c0_3, %c0_4, %c0_5] : memref<2x14x14xf32, #tpu.memory_space<vmem>>, vector<2x14x14xf32>
    tpu.vector_store %arg3[%c0_3, %c0_4, %c0_5], %5 {strides = array<i32>} : memref<2x14x14xf32, #tpu.memory_space<vmem>>, vector<2x14x14xf32>,
    return
  }
  func.func @transform_0(%arg0: i32) -> (i32, i32) {
    %c0_i32 = arith.constant 0 : i32
    %c0_i32_0 = arith.constant 0 : i32
    %c0_i32_1 = arith.constant 0 : i32
    return %c0_i32, %c0_i32_0 : i32, i32
  }
  func.func @transform_1(%arg0: i32) -> (i32, i32, i32) {
    %c0_i32 = arith.constant 0 : i32
    %c0_i32_0 = arith.constant 0 : i32
    %c0_i32_1 = arith.constant 0 : i32
    return %arg0, %c0_i32, %c0_i32_0 : i32, i32, i32
  }
  func.func @transform_2(%arg0: i32) -> (i32, i32, i32) {
    %c0_i32 = arith.constant 0 : i32
    %c0_i32_0 = arith.constant 0 : i32
    %c0_i32_1 = arith.constant 0 : i32
    return %arg0, %c0_i32, %c0_i32_0 : i32, i32, i32
  }
}

</mosaic_0001>

<bundles_post_ra>
// kernel: tpu_custom_call.1
= control target key start
LH: loop header
LB: loop body
LE: loop exit
PB: predicated region body
PF: predicated region fallthrough
CT: control target
= control target key end

     0   :  { %8 = vsyncpa [#allocation4], 0  ;;  %s95_s9 = smov [#allocation3]   ;;  %s141_s0 = inlined_call_operand.<no memory space> [shape: f32[1,1], index: 0, kind: input, shape index: {}]   ;;  %s142_s1 = inlined_call_operand.hbm [shape: f32[2,16,16], index: 1, kind: input, shape index: {}]   ;;  %s143_s2 = inlined_call_operand.vmem [shape: f32[2,14,14], index: 2, kind: output, shape index: {}]  }
   0x1   :  { %s16_s10 = sshll.u32 %s95_s9, 4  ;;  %s71_s13 = scalar_lea.hbm %s142_s1, 512  ;;  %s17_s10 = int_to_ptr.vmem [resolvable:$true] %s16_s10 }
   0x2   :  { %p72_p0 = scmp.ne.s32.totalorder %s142_s1, %s71_s13  ;;  %p75_p1 = scmp.lt.u32.totalorder %s71_s13, %s142_s1 }
   0x4   :  { %p77_p2 = pnand %p75_p1, %p72_p0 }
   0x6   :  { %80 = shalt.err (!%p77_p2)
}
   0x7   :  { %s81_s18 = scalar_lea.vmem %s17_s10, 512  ;;  %p86_p4 = scmp.lt.s32.totalorder %s17_s10, %s17_s10 }
   0x8   :  { %p82_p3 = scmp.ne.s32.totalorder %s17_s10, %s81_s18  ;;  %p87_p5 = scmp.lt.s32.totalorder %s81_s18, %s81_s18 }
   0xa   :  { %p88_p6 = por %p87_p5, %p86_p4 }
   0xc   :  { %p89_p7 = pnand %p88_p6, %p82_p3 }
   0xe   :  { %92 = shalt.err (!%p89_p7)
}
   0xf   :  { %s96_s19 = smov 128   ;;  %s97_s20 = smov 8  }
  0x10   :  { %22 = dma.hbm_to_vmem [thread:$0]  %s142_s1, 512, %s17_s10, [#allocation4], %s96_s19, %s96_s19, %s97_s20  }
  0x11   :  { %93 = dma.done.wait [#allocation4], 512  }
  0x12   :  { %94 = vsyncadd [#allocation4], 4294966784  ;;  %v31_v0 = vstv %s141_s0  ;;  %v29_v1 = vld [vmem:[#allocation3 + $0x11] sm:$0xff]  ;;  %v27_v2 = vld [vmem:[#allocation3 + $0x1] sm:$0xff]  ;;  %s98_s25 = smov 127   ;;  %vm56_vm0 = vcmask 113664  }
  0x13   :  { %v30_v3 = vld [vmem:[#allocation3 + $0x19] sm:$0x3f]  ;;  %v34_v4 = vmul.f32 %v31_v0, %v29_v1  ;;  %v32_v5 = vmul.f32 %v31_v0, %v27_v2  ;;  %v28_v7 = vld [vmem:[#allocation3 + $0x9] sm:$0x3f]  ;;  %vm58_vm1 = vcmask 111616  }
  0x14   :  { %v35_v6 = vmul.f32 %v31_v0, %v30_v3  ;;  %v33_v8 = vmul.f32 %v31_v0, %v28_v7 }
  0x15   :  { %v38_v9 = vmax.f32 %v34_v4, 0.0  ;;  %v36_v10 = vmax.f32 %v32_v5, 0.0 }
  0x16   :  { %v39_v11 = vmax.f32 %v35_v6, 0.0  ;;  %v37_v12 = vmax.f32 %v33_v8, 0.0 }
  0x17   :  { %48 = vrot.lane.b32.xlu1 %v38_v9, %s98_s25  ;;  %44 = vrot.lane.b32.xlu0 %v36_v10, %s98_s25 }
  0x1b   :  { %50 = vrot.lane.b32.xlu1 %v39_v11, %s98_s25  ;;  %46 = vrot.lane.b32.xlu0 %v37_v12, %s98_s25 }
  0x89   :  { %v49_v13 = vpop.permute.xlu1 %48  ;;  %v45_v14 = vpop.permute.xlu0 %44 }
  0x8a   :  { %60 = vst.msk [vmem:[%s143_s2 + $0x10] sm:$0xff] %vm56_vm0, %v49_v13  ;;  %57 = vst.msk [vmem:[%s143_s2] sm:$0xff] %vm56_vm0, %v45_v14 }
  0x8d   :  { %v51_v15 = vpop.permute.xlu1 %50  ;;  %v47_v16 = vpop.permute.xlu0 %46 }
  0x8e   :  { %61 = vst.msk [vmem:[%s143_s2 + $0x18] sm:$0x3f] %vm58_vm1, %v51_v15  ;;  %59 = vst.msk [vmem:[%s143_s2 + $0x8] sm:$0x3f] %vm58_vm1, %v47_v16 }
  0x8f   :  { %66 = vsyncpa [#allocation4], 1 }

</bundles_post_ra>
